<compile_context>
chip_gen: v5e
topology: v5e:2x2
jax: 0.10.0
libtpu: 0.0.40
codegen_flags: <defaults>
</compile_context>

<pallas_src>
import jax
import jax.numpy as jnp
from jax import lax
from jax.experimental import pallas as pl
from jax.experimental.pallas import tpu as pltpu


def _round_up(v, m):
    return (v + m - 1) // m * m


# ----------------------------------------------------------------------------- kernel
def critic_kernel(x_ref, w1_ref, b1_ref, w2_ref, b2_ref, o_ref):
    # Layer 1 on the MXU: (tile_b, F) @ (F, Hp) -> (tile_b, Hp), f32 accumulate.
    h = jnp.dot(x_ref[...], w1_ref[...], preferred_element_type=jnp.float32)
    # Bias + ReLU on the VPU (padded lanes stay exactly zero).
    h = jnp.maximum(h + b1_ref[...], 0.0)
    # Layer 2 (Hp -> 1) as a lane-dense MXU contraction:
    #   out[0, r] = sum_k w2t[0, k] * h[r, k]   -> (1, tile_b)
    out = lax.dot_general(
        w2_ref[...], h,
        dimension_numbers=(((1,), (1,)), ((), ())),
        preferred_element_type=jnp.float32)
    # Scalar bias lives in SMEM.
    o_ref[...] = (out + b2_ref[0, 0]).astype(o_ref.dtype)


# ----------------------------------------------------------------------------- wrapper
def prepare_critic_params(w1, b1, w2, b2, *, use_bf16_inputs=False):
    """One-time parameter preparation (hoisted out of the forward path).

    w1: (F, H)   b1: (H,) or (1, H)   w2: (H, 1)   b2: scalar-like.
    Zero-padding H -> Hp (multiple of 128) preserves the math exactly
    (ReLU(x@0 + 0) = 0 and zero w2 rows contribute nothing).
    """
    F, H = w1.shape
    Hp = _round_up(H, 128)                     # 200 -> 256: unmasked lanes
    in_dtype = jnp.bfloat16 if use_bf16_inputs else jnp.float32

    w1p = jnp.zeros((F, Hp), in_dtype).at[:, :H].set(w1.astype(in_dtype))
    b1p = jnp.zeros((1, Hp), jnp.float32).at[:, :H].set(
        jnp.reshape(b1, (1, H)).astype(jnp.float32))
    w2t = jnp.zeros((1, Hp), jnp.float32).at[:, :H].set(
        jnp.reshape(w2, (1, H)).astype(jnp.float32))
    b2s = jnp.reshape(b2, (1, 1)).astype(jnp.float32)

    return {"w1p": w1p, "b1p": b1p, "w2t": w2t, "b2s": b2s,
            "F": F, "H": H, "Hp": Hp, "in_dtype": in_dtype}


def _choose_tile_b(B, F, Hp, in_bytes):
    """Batch tile sized from the per-step byte footprint (not a flat constant)."""
    # Per-row VMEM cost: double-buffered x row + f32 hidden row + output lane.
    per_row = 2 * F * in_bytes + Hp * 4 + 8
    # Target ~10 MiB total so 2*vmem_needed stays inside the smallest scoped
    # VMEM default (v5e: 16 MiB) after the resident (F, Hp) weight is counted.
    budget = max(1 << 20, (10 << 20) - F * Hp * in_bytes - 4 * Hp * 4)
    tile = max(8, min(budget // per_row, 8192))
    if B >= 16:
        # Keep >= 2 grid steps so the "parallel" axis can split across the
        # two TensorCores of a v7x chip.
        tile = min(tile, -(-B // 2))
    if tile >= B:
        return B                               # single full block, no padding
    mult = 128 if tile >= 128 else 8           # lane-dense output when large
    return max((tile // mult) * mult, 8)


def critic_forward(x, params):
    """y = relu(x @ w1 + b1) @ w2 + b2 via a batch-tiled Pallas kernel."""
    B, F = x.shape
    assert F == params["F"], (F, params["F"])
    Hp = params["Hp"]
    in_dtype = params["in_dtype"]
    in_bytes = jnp.dtype(in_dtype).itemsize

    # Only cast if the dtype actually differs (no-op for the fp32 path).
    xk = x if x.dtype == in_dtype else x.astype(in_dtype)

    tile_b = _choose_tile_b(B, F, Hp, in_bytes)
    num_tiles = pl.cdiv(B, tile_b)             # last block may be partial

    vmem_needed = (
        2 * tile_b * F * in_bytes              # x tile, double-buffered
        + F * Hp * in_bytes                    # w1 (VMEM-resident)
        + 2 * Hp * 4                           # b1, w2^T (resident)
        + 2 * tile_b * 4                       # output tile, double-buffered
        + tile_b * Hp * 4                      # f32 hidden intermediate
    )
    # Cap at 48 MiB: leaves headroom on v7x's 64 MiB physical VMEM.
    vmem_limit = int(min(max(2 * vmem_needed, 16 << 20), 48 << 20))

    out = pl.pallas_call(
        critic_kernel,
        out_shape=jax.ShapeDtypeStruct((num_tiles, tile_b), jnp.float32),
        grid=(num_tiles,),
        in_specs=[
            pl.BlockSpec((tile_b, F), lambda i: (i, 0)),        # x: batch-tiled
            pl.BlockSpec((F, Hp), lambda i: (0, 0)),            # w1: resident
            pl.BlockSpec((1, Hp), lambda i: (0, 0)),            # b1: resident
            pl.BlockSpec((1, Hp), lambda i: (0, 0)),            # w2^T: resident
            pl.BlockSpec(memory_space=pltpu.MemorySpace.SMEM),  # b2 scalar
        ],
        out_specs=pl.BlockSpec((1, tile_b), lambda i: (i, 0)),  # lane-dense rows
        compiler_params=pltpu.CompilerParams(
            dimension_semantics=("parallel",),
            vmem_limit_bytes=vmem_limit,
        ),
    )(xk, params["w1p"], params["b1p"], params["w2t"], params["b2s"])

    # (num_tiles, tile_b) -> (B, 1); rows past B (from the partial last block)
    # are independent and simply dropped.
    return out.reshape(num_tiles * tile_b, 1)[:B].astype(x.dtype)


# ----------------------------------------------------------------------------- init / reference
def init_critic_params(key, feature_dim, hidden=200, out_dim=1, dtype=jnp.float32):
    """Mimics PyTorch nn.Linear defaults: U(-1/sqrt(fan_in), 1/sqrt(fan_in))."""
    k1, k2, k3, k4 = jax.random.split(key, 4)
    bound1 = 1.0 / jnp.sqrt(jnp.array(feature_dim, dtype))
    bound2 = 1.0 / jnp.sqrt(jnp.array(hidden, dtype))
    w1 = jax.random.uniform(k1, (feature_dim, hidden), dtype, -bound1, bound1)
    b1 = jax.random.uniform(k2, (1, hidden), dtype, -bound1, bound1)
    w2 = jax.random.uniform(k3, (hidden, out_dim), dtype, -bound2, bound2)
    b2 = jax.random.uniform(k4, (1, out_dim), dtype, -bound2, bound2)
    return w1, b1, w2, b2


def _reference(x, w1, b1, w2, b2):
    return jnp.maximum(x @ w1 + jnp.reshape(b1, (1, -1)), 0.0) @ w2 + jnp.reshape(b2, (1, 1))


if __name__ == "__main__":
    key = jax.random.PRNGKey(0)
    feature_dim = 32

    kp, kx1, kx2 = jax.random.split(key, 3)
    w1, b1, w2, b2 = init_critic_params(kp, feature_dim)
    params = prepare_critic_params(w1, b1, w2, b2)   # one-time prep (hoisted)

    # Small single-tile case (matches the module's toy usage).
    batch = 8
    x1 = jax.random.normal(kx1, (batch, feature_dim), jnp.float32)
    out1 = jax.block_until_ready(critic_forward(x1, params))
    ref1 = _reference(x1, w1, b1, w2, b2)
    assert out1.shape == (batch, 1), out1.shape
    assert jnp.allclose(out1, ref1, atol=2e-5, rtol=1e-5), "mismatch vs reference (B=8)"

    # Multi-tile, ragged batch: exercises the grid, partial last block,
    # resident weights and the lane-dense output path.
    batch2 = 300
    x2 = jax.random.normal(kx2, (batch2, feature_dim), jnp.float32)
    out2 = jax.block_until_ready(critic_forward(x2, params))
    ref2 = _reference(x2, w1, b1, w2, b2)
    assert out2.shape == (batch2, 1), out2.shape
    assert jnp.allclose(out2, ref2, atol=2e-5, rtol=1e-5), "mismatch vs reference (B=300)"

    print("KERNEL_OK")
</pallas_src>

<mosaic_0001>
module attributes {stable_mosaic.version = 11 : i64} {
  func.func @critic_kernel(%arg0: i32, %arg1: memref<8x32xf32, #tpu.memory_space<vmem>>, %arg2: memref<32x256xf32, #tpu.memory_space<vmem>>, %arg3: memref<1x256xf32, #tpu.memory_space<vmem>>, %arg4: memref<1x256xf32, #tpu.memory_space<vmem>>, %arg5: memref<1x1xf32, #tpu.memory_space<smem>>, %arg6: memref<1x8xf32, #tpu.memory_space<vmem>>) attributes {dimension_semantics = [#tpu.dimension_semantics<parallel>], iteration_bounds = array<i64: 1>, scalar_prefetch = 0 : i64, scratch_operands = 0 : i64, tpu.core_type = #tpu.core_type<tc>, window_params = [{transform_indices = @transform_0, window_bounds = array<i64: 8, 32>}, {pipeline_mode = #tpu.pipeline_mode<synchronous>, transform_indices = @transform_1, window_bounds = array<i64: 32, 256>}, {pipeline_mode = #tpu.pipeline_mode<synchronous>, transform_indices = @transform_2, window_bounds = array<i64: 1, 256>}, {pipeline_mode = #tpu.pipeline_mode<synchronous>, transform_indices = @transform_3, window_bounds = array<i64: 1, 256>}, {transform_indices = @transform_4, window_bounds = array<i64: 1, 1>}, {transform_indices = @transform_5, window_bounds = array<i64: 1, 8>}]} {
    %c0 = arith.constant 0 : index
    %c0_0 = arith.constant 0 : index
    %0 = vector.load %arg1[%c0, %c0_0] : memref<8x32xf32, #tpu.memory_space<vmem>>, vector<8x32xf32>
    %c0_1 = arith.constant 0 : index
    %c0_2 = arith.constant 0 : index
    %1 = vector.load %arg2[%c0_1, %c0_2] : memref<32x256xf32, #tpu.memory_space<vmem>>, vector<32x256xf32>
    %cst = arith.constant dense<0.000000e+00> : vector<8x256xf32>
    %2 = tpu.matmul %0, %1, %cst {dimension_numbers = #tpu.dot_dimension_numbers<[1], [0], [0], [1], [0, 0, 1, 1], [], []>} : vector<8x32xf32>, vector<32x256xf32>, vector<8x256xf32> -> vector<8x256xf32>
    %c0_3 = arith.constant 0 : index
    %c0_4 = arith.constant 0 : index
    %3 = vector.load %arg3[%c0_3, %c0_4] : memref<1x256xf32, #tpu.memory_space<vmem>>, vector<1x256xf32>
    %4 = vector.broadcast %3 : vector<1x256xf32> to vector<8x256xf32>
    %5 = arith.addf %2, %4 : vector<8x256xf32>
    %cst_5 = arith.constant 0.000000e+00 : f32
    %6 = vector.broadcast %cst_5 : f32 to vector<8x256xf32>
    %7 = arith.maximumf %5, %6 : vector<8x256xf32>
    %c0_6 = arith.constant 0 : index
    %c0_7 = arith.constant 0 : index
    %8 = vector.load %arg4[%c0_6, %c0_7] : memref<1x256xf32, #tpu.memory_space<vmem>>, vector<1x256xf32>
    %cst_8 = arith.constant dense<0.000000e+00> : vector<1x8xf32>
    %9 = tpu.matmul %8, %7, %cst_8 {dimension_numbers = #tpu.dot_dimension_numbers<[1], [1], [0], [0], [0, 0, 1, 0], [], []>} : vector<1x256xf32>, vector<8x256xf32>, vector<1x8xf32> -> vector<1x8xf32>
    %c0_9 = arith.constant 0 : index
    %c0_10 = arith.constant 0 : index
    %10 = memref.load %arg5[%c0_9, %c0_10] : memref<1x1xf32, #tpu.memory_space<smem>>
    %11 = vector.broadcast %10 : f32 to vector<1x8xf32>
    %12 = arith.addf %9, %11 : vector<1x8xf32>
    %c0_11 = arith.constant 0 : index
    %c0_12 = arith.constant 0 : index
    %13 = vector.load %arg6[%c0_11, %c0_12] : memref<1x8xf32, #tpu.memory_space<vmem>>, vector<1x8xf32>
    tpu.vector_store %arg6[%c0_11, %c0_12], %12 {strides = array<i32>} : memref<1x8xf32, #tpu.memory_space<vmem>>, vector<1x8xf32>,
    return
  }
  func.func @transform_0(%arg0: i32) -> (i32, i32) {
    %c0_i32 = arith.constant 0 : i32
    %c0_i32_0 = arith.constant 0 : i32
    return %arg0, %c0_i32 : i32, i32
  }
  func.func @transform_1(%arg0: i32) -> (i32, i32) {
    %c0_i32 = arith.constant 0 : i32
    %c0_i32_0 = arith.constant 0 : i32
    %c0_i32_1 = arith.constant 0 : i32
    return %c0_i32, %c0_i32_0 : i32, i32
  }
  func.func @transform_2(%arg0: i32) -> (i32, i32) {
    %c0_i32 = arith.constant 0 : i32
    %c0_i32_0 = arith.constant 0 : i32
    %c0_i32_1 = arith.constant 0 : i32
    return %c0_i32, %c0_i32_0 : i32, i32
  }
  func.func @transform_3(%arg0: i32) -> (i32, i32) {
    %c0_i32 = arith.constant 0 : i32
    %c0_i32_0 = arith.constant 0 : i32
    %c0_i32_1 = arith.constant 0 : i32
    return %c0_i32, %c0_i32_0 : i32, i32
  }
  func.func @transform_4(%arg0: i32) -> (i32, i32) {
    %c0_i32 = arith.constant 0 : i32
    %c0_i32_0 = arith.constant 0 : i32
    %c0_i32_1 = arith.constant 0 : i32
    return %c0_i32, %c0_i32_0 : i32, i32
  }
  func.func @transform_5(%arg0: i32) -> (i32, i32) {
    %c0_i32 = arith.constant 0 : i32
    %c0_i32_0 = arith.constant 0 : i32
    return %arg0, %c0_i32 : i32, i32
  }
}

</mosaic_0001>

<bundles_post_ra>
// kernel: tpu_custom_call.1
= control target key start
LH: loop header
LB: loop body
LE: loop exit
PB: predicated region body
PF: predicated region fallthrough
CT: control target
= control target key end

     0   :  { %11 = vsyncpa [#allocation4], 0  ;;  %s319_s0 = inlined_call_operand.hbm [shape: f32[8,32], index: 0, kind: input, shape index: {}]   ;;  %s320_s1 = inlined_call_operand.hbm [shape: f32[32,256], index: 1, kind: input, shape index: {}]   ;;  %s321_s2 = inlined_call_operand.vmem [shape: f32[1,256], index: 2, kind: input, shape index: {}]   ;;  %s322_s3 = inlined_call_operand.vmem [shape: f32[1,256], index: 3, kind: input, shape index: {}]   ;;  %s323_s4 = inlined_call_operand.<no memory space> [shape: f32[1,1], index: 4, kind: input, shape index: {}]   ;;  %s324_s5 = inlined_call_operand.hbm [shape: f32[1,8], index: 5, kind: output, shape index: {}]  }
   0x1   :  { %12 = vsyncpa [#allocation7], 0 }
   0x2   :  { %13 = vsyncpa [#allocation5], 0  ;;  %s19_s20 = sshll.u32 %s319_s0, 4  ;;  %s266_s21 = smov [#allocation3]   ;;  %s20_s20 = int_to_ptr.hbm [resolvable:$true] %s19_s20 }
   0x3   :  { %s21_s22 = sshll.u32 %s266_s21, 4  ;;  %s29_s25 = sshll.u32 %s320_s1, 4  ;;  %s22_s22 = int_to_ptr.vmem [resolvable:$true] %s21_s22  ;;  %s30_s25 = int_to_ptr.hbm [resolvable:$true] %s29_s25 }
   0x4   :  { %24 = dma.hbm_to_vmem [thread:$0]  %s20_s20, 128, %s22_s22, [#allocation4]  }
   0x5   :  { %s267_s26 = smov [#allocation6]   ;;  %s268_s28 = smov 256  }
   0x6   :  { %s31_s27 = sshll.u32 %s267_s26, 4  ;;  %s269_s29 = smov 16   ;;  %s32_s27 = int_to_ptr.vmem [resolvable:$true] %s31_s27 }
   0x7   :  { %37 = dma.hbm_to_vmem [thread:$0]  %s30_s25, 1024, %s32_s27, [#allocation7], %s268_s28, %s268_s28, %s269_s29  }
   0x8   :  { %260 = dma.done.wait [#allocation4], 128  }
   0x9   :  { %261 = vsyncadd [#allocation4], 4294967168 }
   0xa   :  { %262 = dma.done.wait [#allocation7], 1024  }
   0xb   :  { %263 = vsyncadd [#allocation7], 4294966272  ;;  %v59_v0 = vld [vmem:[#allocation6 + $0x30] sm:$0xff]  ;;  %v57_v1 = vld [vmem:[#allocation6 + $0x20] sm:$0xff]  ;;  %vm67_vm0 = vcmask 261120   ;;  %v115_v21 = vstv %s323_s4  ;;  %s270_s8 = smov [#allocation8]  }
   0xc   :  { %v60_v2 = vld [vmem:[#allocation6 + $0x38] sm:$0xff]  ;;  %83 = vmatpush.msra.mxu0 %v59_v0  ;;  %v58_v3 = vld [vmem:[#allocation6 + $0x28] sm:$0xff]  ;;  %v55_v4 = vld [vmem:[#allocation6 + $0x10] sm:$0xff]  ;;  %s168_s9 = sshll.u32 %s270_s8, 4  ;;  %vm161_vm1 = vcmask 57344   ;;  %s169_s9 = int_to_ptr.vmem [resolvable:$true] %s168_s9 }
   0xd   :  { %103 = vmatpush.msra.mxu1 %v60_v2  ;;  %v56_v5 = vld [vmem:[#allocation6 + $0x18] sm:$0xff]  ;;  %v53_v6 = vld [vmem:[#allocation6] sm:$0xff]  ;;  %v54_v7 = vld [vmem:[#allocation6 + $0x8] sm:$0xff] }
   0xe   :  { %84 = vmatpush.msra.mxu0 %v57_v1  ;;  %v52_v8 = vld [vmem:[#allocation3] sm:$0xff] }
   0xf   :  { %104 = vmatpush.msra.mxu1 %v58_v3  ;;  %v61_v9 = vld [vmem:[%s321_s2] sm:$0x3] }
  0x10   :  { %85 = vmatpush.msra.mxu0 %v55_v4  ;;  %v63_v10 = vperm.slane %v61_v9, 0  ;;  %v64_v11 = vperm.slane %v61_v9, 1  ;;  %v113_v16 = vld [vmem:[%s322_s3] sm:$0x3]  ;;  %s170_s3 = sshll.u32 %s324_s5, 4  ;;  %s171_s3 = int_to_ptr.hbm [resolvable:$true] %s170_s3 }
  0x11   :  { %105 = vmatpush.msra.mxu1 %v56_v5  ;;  %v117_v19 = vperm.slane %v113_v16, 0  ;;  %v118_v20 = vperm.slane %v113_v16, 1 }
  0x12   :  { %86 = vmatpush.msra.mxu0 %v53_v6 }
  0x13   :  { %106 = vmatpush.msra.mxu1 %v54_v7  ;;  %181 = vmatmul.msk.f32.vlgmr.msra.gmra.mxu0 %vm67_vm0, %v52_v8 }
  0x14   :  { %182 = vmatmul.msk.f32.vlgmr.msra.gmra.mxu1 %vm67_vm0, %v52_v8 }
  0x90   :  { %v88_v12 = vpop.f32.mrf.mxu0 }
  0x91   :  { %v108_v13 = vpop.f32.mrf.mxu1  ;;  %v89_v14 = vadd.f32 %v88_v12, %v63_v10 }
  0x92   :  { %v109_v15 = vadd.f32 %v108_v13, %v64_v11 }
  0x93   :  { %v111_v17 = vmax.f32 %v89_v14, 0.0 }
  0x94   :  { %v112_v18 = vmax.f32 %v109_v15, 0.0 }
  0x95   :  { %136 = vmatpush.xpose.msra.mxu2 %v111_v17 }
  0x96   :  { %156 = vmatpush.xpose.msra.mxu3 %v112_v18 }
  0x98   :  { %137 = vmatmul.f32.vlgmr.msra.gmra.mxu2 %v117_v19 }
  0x99   :  { %157 = vmatmul.f32.vlgmr.msra.gmra.mxu3 %v118_v20 }
 0x11b   :  { %v138_v22 = vpop.f32.mrf.mxu2 }
 0x11c   :  { %v158_v23 = vpop.f32.mrf.mxu3  ;;  %v139_v24 = vadd.f32 %v138_v22, %v115_v21 }
 0x11e   :  { %v159_v25 = vadd.f32 %v158_v23, %v139_v24 }
 0x120   :  { %162 = vst.msk [vmem:[#allocation8] sm:$0x1] %vm161_vm1, %v159_v25 }
 0x121   :  { %173 = dma.vmem_to_hbm [thread:$0]  %s169_s9, 16, %s171_s3, [#allocation5]  }
 0x122   :  { %264 = dma.done.wait [#allocation5], 16  }
 0x123   :  { %265 = vsyncadd [#allocation5], 4294967280 }
 0x124   :  { %178 = vsyncpa [#allocation4], 1 }
 0x125   :  { %179 = vsyncpa [#allocation7], 1 }
 0x126   :  { %180 = vsyncpa [#allocation5], 1 }

</bundles_post_ra>
